<compile_context>
chip_gen: v5e
topology: v5e:2x2
jax: 0.10.0
libtpu: 0.0.40
codegen_flags: <defaults>
</compile_context>

<pallas_src>
import functools

import jax
import jax.numpy as jnp
from jax.experimental import pallas as pl
from jax.experimental.pallas import tpu as pltpu


# ---------------------------------------------------------------------------
# Shared per-block gate math: pooled -> 1x1 conv -> swish -> 1x1 conv -> sigmoid
# ---------------------------------------------------------------------------
def _se_gate(pooled_f32, w1t, b1, w2t, b2):
    """pooled_f32: (nb, C) f32.  w1t: (C, OC), w2t: (OC, C), b1: (1, OC), b2: (1, C).
    Returns the sigmoid gate, shape (nb, C), f32."""
    c, _ = w1t.shape
    b1f = b1.astype(jnp.float32)
    b2f = b2.astype(jnp.float32)

    use_mxu = c >= 128  # static (trace-time) choice; OC may be < 128 (padded matmul is fine)

    if use_mxu:
        # Keep low-precision weights in their native dtype (bf16 is MXU native),
        # accumulate in f32, add the f32 bias after.
        lhs1 = pooled_f32 if w1t.dtype == jnp.float32 else pooled_f32.astype(w1t.dtype)
        h = jnp.dot(lhs1, w1t, preferred_element_type=jnp.float32) + b1f
        h = h * jax.nn.sigmoid(h)                               # Swish (exp -> EUP slot)
        lhs2 = h if w2t.dtype == jnp.float32 else h.astype(w2t.dtype)
        s = jnp.dot(lhs2, w2t, preferred_element_type=jnp.float32) + b2f
    else:
        # Tiny channel counts: stay on the VPU (broadcast-mult + sublane reduce)
        # instead of a badly padded matmul.
        w1f = w1t.astype(jnp.float32)
        w2f = w2t.astype(jnp.float32)
        h = jnp.sum(pooled_f32[:, :, None] * w1f[None, :, :], axis=1) + b1f     # (nb, OC)
        h = h * jax.nn.sigmoid(h)
        s = jnp.sum(h[:, :, None] * w2f[None, :, :], axis=1) + b2f              # (nb, C)

    return jax.nn.sigmoid(s)                                    # (nb, C) f32


# ---------------------------------------------------------------------------
# Fused single-pass kernel: nb whole batches per grid step
# ---------------------------------------------------------------------------
def se_kernel(x_ref, w1t_ref, b1_ref, w2t_ref, b2_ref, o_ref):
    x = x_ref[...]                                              # (nb, C, HW), input dtype
    hw = x.shape[-1]
    # AdaptiveAvgPool2d(1): lane reduce accumulated in f32 (no full-map upcast).
    pooled = jnp.sum(x, axis=-1, dtype=jnp.float32) * (1.0 / hw)                # (nb, C)
    gate = _se_gate(pooled, w1t_ref[...], b1_ref[...], w2t_ref[...], b2_ref[...])
    o_ref[...] = (x * gate.astype(x.dtype)[:, :, None]).astype(o_ref.dtype)


# ---------------------------------------------------------------------------
# Two-pass fallback (batch slab > block budget): gate kernel + apply kernel
# ---------------------------------------------------------------------------
def se_gate_kernel(x_ref, w1t_ref, b1_ref, w2t_ref, b2_ref, gate_ref, acc_ref, *, inv_hw):
    h_idx = pl.program_id(1)

    @pl.when(h_idx == 0)
    def _():
        acc_ref[...] = jnp.zeros_like(acc_ref)

    acc_ref[...] += jnp.sum(x_ref[...], axis=-1, dtype=jnp.float32)             # (1, C)

    @pl.when(h_idx == pl.num_programs(1) - 1)
    def _():
        pooled = acc_ref[...] * inv_hw                                          # (1, C)
        gate = _se_gate(pooled, w1t_ref[...], b1_ref[...], w2t_ref[...], b2_ref[...])
        gate_ref[...] = gate[:, :, None].astype(gate_ref.dtype)                 # (1, C, 1)


def se_apply_kernel(x_ref, gate_ref, o_ref):
    x = x_ref[...]                                              # (1, C, thw)
    gate = gate_ref[...].astype(x.dtype)                        # (1, C, 1) -> broadcast
    o_ref[...] = (x * gate).astype(o_ref.dtype)


# ---------------------------------------------------------------------------
# Wrapper-side sizing helpers
# ---------------------------------------------------------------------------
def _vmem_capacity_bytes():
    """Physical VMEM per TensorCore (v5e/v6e: 128 MiB, v7x: 64 MiB)."""
    try:
        info = pltpu.get_tpu_info()
        cap = int(getattr(info, "vmem_capacity_bytes", 0) or 0)
        if cap > 0:
            return cap
    except Exception:
        pass
    return 64 << 20      # conservative fallback (v7x per-TC size)


def _pick_nb(n, per_batch_bytes, block_budget):
    """Largest divisor nb of n with nb*per_batch <= budget, preferring an even
    (and >= 4) number of grid steps for 2-TC balance.  None if nothing fits."""
    divisors = [d for d in range(1, n + 1) if n % d == 0]
    fitting = [d for d in divisors if d * per_batch_bytes <= block_budget]
    if not fitting:
        return None
    for pred in (lambda d: (n // d) >= 4 and (n // d) % 2 == 0,
                 lambda d: (n // d) >= 2 and (n // d) % 2 == 0,
                 lambda d: (n // d) >= 2,
                 lambda d: True):
        cands = [d for d in fitting if pred(d)]
        if cands:
            return max(cands)
    return None


def _pick_hw_tile(hw, c, itemsize, block_budget):
    """Largest HW tile that is a multiple of 128, divides HW and fits the budget."""
    best = None
    for t in range(128, hw + 1, 128):
        if hw % t == 0 and c * t * itemsize <= block_budget:
            best = t
    return best


# ---------------------------------------------------------------------------
# pallas_call wrappers
# ---------------------------------------------------------------------------
def _se_fused(x3, w1t, b1r, w2t, b2r, *, nb, usable_vmem, weight_bytes):
    N, C, HW = x3.shape
    OC = w1t.shape[1]
    itemsize = jnp.dtype(x3.dtype).itemsize
    block_bytes = nb * C * HW * itemsize
    vmem_limit = int(min(usable_vmem,
                         max(16 << 20, 4 * block_bytes + 2 * weight_bytes + (2 << 20))))

    return pl.pallas_call(
        se_kernel,
        out_shape=jax.ShapeDtypeStruct((N, C, HW), x3.dtype),
        grid=(N // nb,),
        in_specs=[
            pl.BlockSpec((nb, C, HW), lambda n: (n, 0, 0)),   # x, nb batches per step
            pl.BlockSpec((C, OC), lambda n: (0, 0)),          # w1^T
            pl.BlockSpec((1, OC), lambda n: (0, 0)),          # b1
            pl.BlockSpec((OC, C), lambda n: (0, 0)),          # w2^T
            pl.BlockSpec((1, C), lambda n: (0, 0)),           # b2
        ],
        out_specs=pl.BlockSpec((nb, C, HW), lambda n: (n, 0, 0)),
        compiler_params=pltpu.CompilerParams(
            dimension_semantics=("parallel",),
            vmem_limit_bytes=vmem_limit,
        ),
    )(x3, w1t, b1r, w2t, b2r)


def _se_two_pass(x3, w1t, b1r, w2t, b2r, *, thw, usable_vmem, weight_bytes):
    N, C, HW = x3.shape
    OC = w1t.shape[1]
    itemsize = jnp.dtype(x3.dtype).itemsize
    block_bytes = C * thw * itemsize
    n_hw = HW // thw
    vmem_limit = int(min(usable_vmem,
                         max(16 << 20, 4 * block_bytes + 2 * weight_bytes + (2 << 20))))

    gate_kernel = functools.partial(se_gate_kernel, inv_hw=1.0 / HW)

    # Pass 1: per-batch gate (pooled sum accumulated across HW tiles).
    gate = pl.pallas_call(
        gate_kernel,
        out_shape=jax.ShapeDtypeStruct((N, C, 1), jnp.float32),
        grid=(N, n_hw),
        in_specs=[
            pl.BlockSpec((1, C, thw), lambda n, h: (n, 0, h)),
            pl.BlockSpec((C, OC), lambda n, h: (0, 0)),
            pl.BlockSpec((1, OC), lambda n, h: (0, 0)),
            pl.BlockSpec((OC, C), lambda n, h: (0, 0)),
            pl.BlockSpec((1, C), lambda n, h: (0, 0)),
        ],
        out_specs=pl.BlockSpec((1, C, 1), lambda n, h: (n, 0, 0)),
        scratch_shapes=[pltpu.VMEM((1, C), jnp.float32)],
        compiler_params=pltpu.CompilerParams(
            dimension_semantics=("parallel", "arbitrary"),
            vmem_limit_bytes=vmem_limit,
        ),
    )(x3, w1t, b1r, w2t, b2r)

    # Pass 2: apply the channel gate (second sweep over x, fully parallel).
    return pl.pallas_call(
        se_apply_kernel,
        out_shape=jax.ShapeDtypeStruct((N, C, HW), x3.dtype),
        grid=(N, n_hw),
        in_specs=[
            pl.BlockSpec((1, C, thw), lambda n, h: (n, 0, h)),
            pl.BlockSpec((1, C, 1), lambda n, h: (n, 0, 0)),
        ],
        out_specs=pl.BlockSpec((1, C, thw), lambda n, h: (n, 0, h)),
        compiler_params=pltpu.CompilerParams(
            dimension_semantics=("parallel", "parallel"),
            vmem_limit_bytes=vmem_limit,
        ),
    )(x3, gate)


def se_module(x, w1, b1, w2, b2, *, target_block_bytes=None):
    """x: (N, C, H, W) NCHW like the PyTorch module.
    w1: (OC, C) / b1: (OC,) for Conv2d(C, OC, 1); w2: (C, OC) / b2: (C,)."""
    N, C, H, W = x.shape
    HW = H * W
    OC = w1.shape[0]
    itemsize = jnp.dtype(x.dtype).itemsize

    # Pre-transpose weights so the kernel contracts the channel axis directly.
    w1t = jnp.transpose(w1)              # (C, OC)
    w2t = jnp.transpose(w2)              # (OC, C)
    b1r = b1.reshape(1, OC)
    b2r = b2.reshape(1, C)

    weight_bytes = int(jnp.dtype(w1.dtype).itemsize * (w1t.size + w2t.size)
                       + jnp.dtype(b1.dtype).itemsize * b1r.size
                       + jnp.dtype(b2.dtype).itemsize * b2r.size)

    # Generation-aware VMEM budget: physical capacity minus headroom, and a
    # per-block byte target such that 2x-double-buffered in+out blocks fit.
    vmem_cap = _vmem_capacity_bytes()
    usable_vmem = max(8 << 20, vmem_cap - (8 << 20))
    derived_block_cap = max(1 << 20, (usable_vmem - 2 * weight_bytes - (2 << 20)) // 4)
    if target_block_bytes is None:
        target_block_bytes = 8 << 20     # good for v6e; derived cap clamps it on v7x
    block_budget = min(int(target_block_bytes), int(derived_block_cap))

    x3 = x.reshape(N, C, HW)
    per_batch_bytes = C * HW * itemsize
    nb = _pick_nb(N, per_batch_bytes, block_budget)

    if nb is not None:
        out = _se_fused(x3, w1t, b1r, w2t, b2r, nb=nb,
                        usable_vmem=usable_vmem, weight_bytes=weight_bytes)
    else:
        thw = _pick_hw_tile(HW, C, itemsize, block_budget)
        if thw is not None:
            out = _se_two_pass(x3, w1t, b1r, w2t, b2r, thw=thw,
                               usable_vmem=usable_vmem, weight_bytes=weight_bytes)
        else:
            # TODO(synk): HW not a multiple of 128 (or even a C x 128 tile over
            # budget): no lane-aligned intra-batch tiling available; stream one
            # whole batch per step and rely on the VMEM limit.
            out = _se_fused(x3, w1t, b1r, w2t, b2r, nb=1,
                            usable_vmem=usable_vmem, weight_bytes=weight_bytes)

    return out.reshape(N, C, H, W)


def se_module_ref(x, w1, b1, w2, b2):
    """Pure-JAX reference mirroring the PyTorch forward."""
    pooled = jnp.mean(x, axis=(2, 3))                        # (N, C)
    h = pooled @ w1.T + b1                                   # (N, OC)
    h = h * jax.nn.sigmoid(h)                                # Swish
    s = h @ w2.T + b2                                        # (N, C)
    gate = jax.nn.sigmoid(s)[:, :, None, None]               # (N, C, 1, 1)
    return x * gate


if __name__ == "__main__":
    # Small shapes consistent with the module: in_chl=4, out_chl=2, 16x16 spatial.
    N, IN_CHL, OUT_CHL, H, W = 2, 4, 2, 16, 16

    key = jax.random.PRNGKey(0)
    kx, kw1, kb1, kw2, kb2 = jax.random.split(key, 5)

    x = jax.random.normal(kx, (N, IN_CHL, H, W), dtype=jnp.float32)
    # Conv2d(in_chl, out_chl, 1): weight (out_chl, in_chl, 1, 1) -> (out_chl, in_chl)
    w1 = jax.random.normal(kw1, (OUT_CHL, IN_CHL), dtype=jnp.float32) * 0.5
    b1 = jax.random.normal(kb1, (OUT_CHL,), dtype=jnp.float32) * 0.1
    # Conv2d(out_chl, in_chl, 1): weight (in_chl, out_chl, 1, 1) -> (in_chl, out_chl)
    w2 = jax.random.normal(kw2, (IN_CHL, OUT_CHL), dtype=jnp.float32) * 0.5
    b2 = jax.random.normal(kb2, (IN_CHL,), dtype=jnp.float32) * 0.1

    ref = se_module_ref(x, w1, b1, w2, b2)

    # Main fused path (whole-batch blocks).
    out = jax.block_until_ready(se_module(x, w1, b1, w2, b2))
    assert out.shape == (N, IN_CHL, H, W)
    assert jnp.allclose(out, ref, atol=1e-5, rtol=1e-5)

    # Also exercise the intra-batch HW-tiled two-pass fallback (v7x-sized
    # budgets) on the same data by forcing a tiny block budget.
    out2 = jax.block_until_ready(se_module(x, w1, b1, w2, b2, target_block_bytes=2048))
    assert jnp.allclose(out2, ref, atol=1e-5, rtol=1e-5)

    print("KERNEL_OK")
</pallas_src>

<mosaic_0001>
module attributes {stable_mosaic.version = 11 : i64} {
  func.func @se_kernel(%arg0: i32, %arg1: memref<1x4x256xf32, #tpu.memory_space<vmem>>, %arg2: memref<4x2xf32, #tpu.memory_space<vmem>>, %arg3: memref<1x2xf32, #tpu.memory_space<vmem>>, %arg4: memref<2x4xf32, #tpu.memory_space<vmem>>, %arg5: memref<1x4xf32, #tpu.memory_space<vmem>>, %arg6: memref<1x4x256xf32, #tpu.memory_space<vmem>>) attributes {dimension_semantics = [#tpu.dimension_semantics<parallel>], iteration_bounds = array<i64: 2>, scalar_prefetch = 0 : i64, scratch_operands = 0 : i64, tpu.core_type = #tpu.core_type<tc>, window_params = [{transform_indices = @transform_0, window_bounds = array<i64: 1, 4, 256>}, {pipeline_mode = #tpu.pipeline_mode<synchronous>, transform_indices = @transform_1, window_bounds = array<i64: 4, 2>}, {pipeline_mode = #tpu.pipeline_mode<synchronous>, transform_indices = @transform_2, window_bounds = array<i64: 1, 2>}, {pipeline_mode = #tpu.pipeline_mode<synchronous>, transform_indices = @transform_3, window_bounds = array<i64: 2, 4>}, {pipeline_mode = #tpu.pipeline_mode<synchronous>, transform_indices = @transform_4, window_bounds = array<i64: 1, 4>}, {transform_indices = @transform_5, window_bounds = array<i64: 1, 4, 256>}]} {
    %c0 = arith.constant 0 : index
    %c0_0 = arith.constant 0 : index
    %c0_1 = arith.constant 0 : index
    %0 = vector.load %arg1[%c0, %c0_0, %c0_1] : memref<1x4x256xf32, #tpu.memory_space<vmem>>, vector<1x4x256xf32>
    %cst = arith.constant dense<0.000000e+00> : vector<1x4xf32>
    %1 = vector.multi_reduction <add>, %0, %cst [2] : vector<1x4x256xf32> to vector<1x4xf32>
    %cst_2 = arith.constant 3.906250e-03 : f32
    %2 = vector.broadcast %cst_2 : f32 to vector<1x4xf32>
    %3 = arith.mulf %1, %2 : vector<1x4xf32>
    %c0_3 = arith.constant 0 : index
    %c0_4 = arith.constant 0 : index
    %4 = vector.load %arg2[%c0_3, %c0_4] : memref<4x2xf32, #tpu.memory_space<vmem>>, vector<4x2xf32>
    %c0_5 = arith.constant 0 : index
    %c0_6 = arith.constant 0 : index
    %5 = vector.load %arg3[%c0_5, %c0_6] : memref<1x2xf32, #tpu.memory_space<vmem>>, vector<1x2xf32>
    %c0_7 = arith.constant 0 : index
    %c0_8 = arith.constant 0 : index
    %6 = vector.load %arg4[%c0_7, %c0_8] : memref<2x4xf32, #tpu.memory_space<vmem>>, vector<2x4xf32>
    %c0_9 = arith.constant 0 : index
    %c0_10 = arith.constant 0 : index
    %7 = vector.load %arg5[%c0_9, %c0_10] : memref<1x4xf32, #tpu.memory_space<vmem>>, vector<1x4xf32>
    %8 = vector.shape_cast %3 : vector<1x4xf32> to vector<1x4x1xf32>
    %9 = vector.shape_cast %4 : vector<4x2xf32> to vector<1x4x2xf32>
    %10 = vector.broadcast %8 : vector<1x4x1xf32> to vector<1x4x2xf32>
    %11 = arith.mulf %10, %9 : vector<1x4x2xf32>
    %cst_11 = arith.constant dense<0.000000e+00> : vector<1x2xf32>
    %12 = vector.multi_reduction <add>, %11, %cst_11 [1] : vector<1x4x2xf32> to vector<1x2xf32>
    %13 = arith.addf %12, %5 : vector<1x2xf32>
    %14 = arith.negf %13 : vector<1x2xf32>
    %15 = math.exp %14 : vector<1x2xf32>
    %cst_12 = arith.constant 1.000000e+00 : f32
    %16 = vector.broadcast %cst_12 : f32 to vector<1x2xf32>
    %17 = arith.addf %16, %15 : vector<1x2xf32>
    %18 = arith.divf %16, %17 : vector<1x2xf32>
    %19 = arith.mulf %13, %18 : vector<1x2xf32>
    %20 = vector.shape_cast %19 : vector<1x2xf32> to vector<1x2x1xf32>
    %21 = vector.shape_cast %6 : vector<2x4xf32> to vector<1x2x4xf32>
    %22 = vector.broadcast %20 : vector<1x2x1xf32> to vector<1x2x4xf32>
    %23 = arith.mulf %22, %21 : vector<1x2x4xf32>
    %cst_13 = arith.constant dense<0.000000e+00> : vector<1x4xf32>
    %24 = vector.multi_reduction <add>, %23, %cst_13 [1] : vector<1x2x4xf32> to vector<1x4xf32>
    %25 = arith.addf %24, %7 : vector<1x4xf32>
    %26 = arith.negf %25 : vector<1x4xf32>
    %27 = math.exp %26 : vector<1x4xf32>
    %cst_14 = arith.constant 1.000000e+00 : f32
    %28 = vector.broadcast %cst_14 : f32 to vector<1x4xf32>
    %29 = arith.addf %28, %27 : vector<1x4xf32>
    %30 = arith.divf %28, %29 : vector<1x4xf32>
    %31 = vector.shape_cast %30 : vector<1x4xf32> to vector<1x4x1xf32>
    %32 = vector.broadcast %31 : vector<1x4x1xf32> to vector<1x4x256xf32>
    %33 = arith.mulf %0, %32 : vector<1x4x256xf32>
    %c0_15 = arith.constant 0 : index
    %c0_16 = arith.constant 0 : index
    %c0_17 = arith.constant 0 : index
    %34 = vector.load %arg6[%c0_15, %c0_16, %c0_17] : memref<1x4x256xf32, #tpu.memory_space<vmem>>, vector<1x4x256xf32>
    tpu.vector_store %arg6[%c0_15, %c0_16, %c0_17], %33 {strides = array<i32>} : memref<1x4x256xf32, #tpu.memory_space<vmem>>, vector<1x4x256xf32>,
    return
  }
  func.func @transform_0(%arg0: i32) -> (i32, i32, i32) {
    %c0_i32 = arith.constant 0 : i32
    %c0_i32_0 = arith.constant 0 : i32
    %c0_i32_1 = arith.constant 0 : i32
    return %arg0, %c0_i32, %c0_i32_0 : i32, i32, i32
  }
  func.func @transform_1(%arg0: i32) -> (i32, i32) {
    %c0_i32 = arith.constant 0 : i32
    %c0_i32_0 = arith.constant 0 : i32
    %c0_i32_1 = arith.constant 0 : i32
    return %c0_i32, %c0_i32_0 : i32, i32
  }
  func.func @transform_2(%arg0: i32) -> (i32, i32) {
    %c0_i32 = arith.constant 0 : i32
    %c0_i32_0 = arith.constant 0 : i32
    %c0_i32_1 = arith.constant 0 : i32
    return %c0_i32, %c0_i32_0 : i32, i32
  }
  func.func @transform_3(%arg0: i32) -> (i32, i32) {
    %c0_i32 = arith.constant 0 : i32
    %c0_i32_0 = arith.constant 0 : i32
    %c0_i32_1 = arith.constant 0 : i32
    return %c0_i32, %c0_i32_0 : i32, i32
  }
  func.func @transform_4(%arg0: i32) -> (i32, i32) {
    %c0_i32 = arith.constant 0 : i32
    %c0_i32_0 = arith.constant 0 : i32
    %c0_i32_1 = arith.constant 0 : i32
    return %c0_i32, %c0_i32_0 : i32, i32
  }
  func.func @transform_5(%arg0: i32) -> (i32, i32, i32) {
    %c0_i32 = arith.constant 0 : i32
    %c0_i32_0 = arith.constant 0 : i32
    %c0_i32_1 = arith.constant 0 : i32
    return %arg0, %c0_i32, %c0_i32_0 : i32, i32, i32
  }
}

</mosaic_0001>

<bundles_post_ra>
// kernel: tpu_custom_call.1
= control target key start
LH: loop header
LB: loop body
LE: loop exit
PB: predicated region body
PF: predicated region fallthrough
CT: control target
= control target key end

     0   :  { %10 = vsyncpa [#allocation3], 0  ;;  %s780_s0 = inlined_call_operand.hbm [shape: f32[2,4,256], index: 0, kind: input, shape index: {}]   ;;  %s781_s1 = inlined_call_operand.vmem [shape: f32[4,2], index: 1, kind: input, shape index: {}]   ;;  %s782_s2 = inlined_call_operand.vmem [shape: f32[1,2], index: 2, kind: input, shape index: {}]   ;;  %s783_s3 = inlined_call_operand.vmem [shape: f32[2,4], index: 3, kind: input, shape index: {}]   ;;  %s784_s4 = inlined_call_operand.vmem [shape: f32[1,4], index: 4, kind: input, shape index: {}]   ;;  %s785_s5 = inlined_call_operand.hbm [shape: f32[2,4,256], index: 5, kind: output, shape index: {}]  }
   0x1   :  { %12 = vsyncpa [#allocation3 + $0x1], 0 }
   0x2   :  { %13 = vsyncpa [#allocation4], 0 }
   0x3   :  { %15 = vsyncpa [#allocation4 + $0x1], 0  ;;  %s633_s18 = smov 0   ;;  %s635_s19 = smov 0  }
   0x4   :  { %s637_s20 = smov 0   ;;  %s639_s21 = smov 0  }
   0x5 LB: > { %s654_s22 = sadd.s32 4294967295, %s600_s21   ;;  %s429_s23 = sadd.s32 4294967294, %s600_s21   ;;  %s600_s21 = sphi %s639_s21, %s795_s21   ;;  %s596_s20 = sphi %s637_s20, %s794_s20   ;;  %s592_s19 = sphi %s635_s19, %s793_s19   ;;  %s588_s18 = sphi %s633_s18, %s792_s18  }
   0x6   : > { %s658_s24 = sadd.s32 1, %s600_s21   ;;  %s28_s25 = sadd.s32 1, %s596_s20 }
   0x7   : > { %s25_s26 = ssub.s32 %s600_s21, %s658_s24  ;;  %p35_p0 = scmp.ne.s32.totalorder %s596_s20, %s592_s19 }
   0x8   : > { %p26_p1 = scmp.eq.s32.totalorder %s25_s26, 0  ;;  %p36_p2 = scmp.eq.s32.totalorder %s600_s21, 0 }
   0x9   : > { %p41_p3 = scmp.ne.s32.totalorder %s592_s19, %s588_s18  ;;  %p42_p4 = scmp.eq.s32.totalorder %s654_s22, 0 }
   0xa   : > { %s670_s27 = scalar_select %p26_p1, %s596_s20, %s28_s25  }
   0xb   : > { %p672_p5 = por %p36_p2, %p35_p0  ;;  %p676_p6 = por %p42_p4, %p41_p3 }
   0xc   : > { %p149_p7 = scmp.eq.s32.totalorder %s654_s22, 1  ;;  %p155_p8 = scmp.eq.s32.totalorder %s429_s23, 1 }
   0xd   : > { %p459_p10 = scmp.lt.s32.totalorder %s600_s21, 2  ;;  %s187_s7 = sand.u32 1, %s596_s20  }
   0xe   : > { %p683_p11 = por %p149_p7, %p35_p0  ;;  %p687_p12 = por %p155_p8, %p41_p3 }
   0xf   : > { %s445_s8 = sshll.u32 %s600_s21, 3  ;;  %s432_s9 = sshll.u32 %s187_s7, 3 }
  0x10   : > { %s196_s12 = scalar_lea.hbm %s780_s0, %s445_s8  ;;  %s191_s14 = scalar_lea.vmem [#allocation2], %s432_s9 }
  0x11   : > { %s198_s13 = sshll.u32 %s196_s12, 4  ;;  %s200_s15 = sshll.u32 %s191_s14, 4  ;;  %s199_s13 = int_to_ptr.hbm [resolvable:$true] %s198_s13  ;;  %s201_s15 = int_to_ptr.vmem [resolvable:$true] %s200_s15 }
  0x12   : > { %p698_p13 = pnand %p459_p10, %p672_p5  ;;  %p435_p0 = scmp.ge.s32.totalorder %s600_s21, 1 }
  0x13   : > { %p205_p1 = scmp.lt.s32.totalorder %s600_s21, 3  ;;  %s188_s17 = scalar_lea.sflag [#allocation3], %s187_s7 }
  0x14   : > { %s504_s23 = sshra.s32 %s199_s13, 4  ;;  %p508_p3 = pneg %p698_p13  ;;  %s505_s23 = int_to_ptr.hbm [resolvable:$true] %s504_s23 }
  0x15   : > { %s506_s25 = scalar_lea.hbm %s505_s23, 8  ;;  %s511_s28 = scalar_lea.hbm %s780_s0, 16 }
  0x16   : > { %p507_p2 = scmp.ne.s32.totalorder %s505_s23, %s506_s25  ;;  %p512_p5 = scmp.lt.s32.totalorder %s505_s23, %s780_s0 }
  0x17   : > { %p513_p8 = scmp.lt.s32.totalorder %s511_s28, %s506_s25 }
  0x18   : > { %p509_p4 = pnand %p508_p3, %p507_p2 }
  0x19   : > { %p514_p10 = por %p513_p8, %p512_p5 }
  0x1a   : > { %p510_p7 = pneg %p509_p4 }
  0x1c   : > { %p515_p9 = pnand %p514_p10, %p510_p7 }
  0x1e   : > { %518 = shalt.err (!%p515_p9)
}
  0x1f   : > { %454 = dma.hbm_to_vmem [thread:$0]  (!%p698_p13), %s199_s13, 128, %s201_s15, %s188_s17  }
  0x20   : > { %p206_p2 = pnand %p435_p0, %p205_p1 }
  0x21   : > { %s719_s7 = sand.u32 (!%p206_p2), 1, %s592_s19  }
  0x22   : > { %209 = sbr.rel (%p206_p2) target bundleno = 503 (0x1f7), region = 40  ;;  %s436_s11 = sshll.u32 (!%p206_p2), %s719_s7, 3 }
  0x23   : > { %s212_s12 = scalar_lea.sflag (!%p206_p2), [#allocation3], %s719_s7  ;;  %s215_s14 = scalar_lea.vmem (!%p206_p2), [#allocation2], %s436_s11 }
  0x27   : > { %579 = dma.done.wait (%p676_p6), %s212_s12, 128  }
  0x28   : > { %581 = vsyncadd (%p676_p6), %s212_s12, 4294967168  ;;  %v729_v0 = vld [vmem:[%s215_s14] sm:$0xff]  ;;  %vm250_vm0 = vcmask 1043456   ;;  %v292_v6 = vlaneseq  ;;  %v257_v8 = vld [vmem:[%s781_s1] sm:$0xf]  ;;  %vm262_vm1 = vcmask 11264  }
  0x29   : > { %245 = vst [vmem:[#allocation1] ss:$2 sm:$0xff] %v729_v0  ;;  %v258_v18 = vld [vmem:[%s782_s2] sm:$0x1]  ;;  %vm299_vm6 = vcmask 25600   ;;  %s446_s8 = sshll.u32 %s654_s22, 3 }
  0x2a   : > { %v293_v7 = vshrl.u32 %v292_v6, 7  ;;  %v259_v36 = vld [vmem:[%s783_s3] sm:$0x3]  ;;  %v602_v62 = vmov 839922192   ;;  %s354_s10 = scalar_lea.hbm %s785_s5, %s446_s8  ;;  %s242_s12 = scalar_lea.vmem [#allocation5], %s436_s11 }
  0x2b   : > { %v260_v45 = vld [vmem:[%s784_s4] sm:$0x1]  ;;  %v336_v63 = vunpack.c.l.s4 %v602_v62  ;;  %s356_s14 = sshll.u32 %s242_s12, 4  ;;  %s358_s13 = sshll.u32 %s354_s10, 4  ;;  %s357_s14 = int_to_ptr.vmem [resolvable:$true] %s356_s14  ;;  %s359_s13 = int_to_ptr.hbm [resolvable:$true] %s358_s13 }
  0x2c   : > { %494 = vset.pattern.permute.xlu0 %v293_v7  ;;  %495 = vset.pattern.permute.xlu1 %v293_v7  ;;  %s343_s15 = scalar_lea.sflag [#allocation4], %s719_s7  ;;  %s548_s29 = sshra.s32 %s359_s13, 4  ;;  %s549_s29 = int_to_ptr.hbm [resolvable:$true] %s548_s29 }
  0x2d   : > { %s550_s22 = scalar_lea.hbm %s549_s29, 8  ;;  %s554_s11 = scalar_lea.hbm %s785_s5, 16 }
  0x2e   : > { %p551_p6 = scmp.ne.s32.totalorder %s549_s29, %s550_s22  ;;  %p555_p0 = scmp.lt.s32.totalorder %s549_s29, %s785_s5 }
  0x2f   : > { %p556_p1 = scmp.lt.s32.totalorder %s554_s11, %s550_s22 }
  0x30   : > { %v246_v1 = vld.sshfl [vmem:[#allocation1] sm:$0xff pattern:$0x75316420]  ;;  %v247_v2 = vld.sshfl [vmem:[#allocation1 + $0x8] sm:$0xff pattern:$0x75316420]  ;;  %p552_p9 = pnand %p551_p6, %p683_p11 }
  0x31   : > { %v251_v3 = vsel %vm250_vm0, %v246_v1, 0.0  ;;  %v252_v4 = vsel %vm250_vm0, %v247_v2, 0.0  ;;  %v337_v1 = vunpack.c.0.s8 %v336_v63  ;;  %p557_p3 = por %p556_p1, %p555_p0 }
  0x32   : > { %v253_v5 = vadd.f32 %v252_v4, %v251_v3  ;;  %p553_p13 = pneg %p552_p9 }
  0x34   : > { %254 = vadd.xlane.f32.xlu0 %v253_v5  ;;  %p558_p4 = pnand %p557_p3, %p553_p13 }
  0xa7   : > { %v255_v9 = vpop.xlane.xlu0 %254 }
  0xa8   : > { %v256_v10 = vmul.f32 0.00390625, %v255_v9 }
  0xaa   : > { %v261_v11 = vmul.f32 %v257_v8, %v256_v10 }
  0xac   : > { %v263_v12 = vsel %vm262_vm1, %v261_v11, 0.0 }
  0xad   : > { %v264_v13 = vrot.slane %v263_v12, 4 }
  0xaf   : > { %v265_v14 = vadd.f32 %v264_v13, %v263_v12 }
  0xb1   : > { %v266_v15 = vrot.slane %v265_v14, 2 }
  0xb3   : > { %v267_v16 = vadd.f32 %v266_v15, %v265_v14 }
  0xb5   : > { %v268_v17 = vrot.slane %v267_v16, 1 }
  0xb7   : > { %v269_v19 = vadd.f32 %v268_v17, %v267_v16 }
  0xb9   : > { %v270_v20 = vadd.f32 %v269_v19, %v258_v18 }
  0xbb   : > { %v438_v21 = vmul.f32 -1.442695, %v270_v20 }
  0xbd   : > { %496 = vpow2.f32 %v438_v21 }
  0xc3   : > { %v497_v22 = vpop.eup %496 }
  0xc4   : > { %v274_v23 = vadd.f32 1.0, %v497_v22 }
  0xc6   : > { %498 = vrcp.f32 %v274_v23  ;;  %v286_v27 = vand.u32 2147483648, %v274_v23  ;;  %v284_v29 = vand.u32 2147483647, %v274_v23  ;;  %vm280_vm3 = vweird.f32 %v274_v23 }
  0xc8   : > { %v287_v31 = vor.u32 1.1754944e-38, %v286_v27  ;;  %vm285_vm5 = vcmp.eq.f32.partialorder %v284_v29, 8.507059e+37 }
  0xcc   : > { %v499_v24 = vpop.eup %498 }
  0xcd   : > { %v276_v25 = vmul.f32 %v499_v24, %v274_v23  ;;  %vm281_vm2 = vweird.f32 %v499_v24 }
  0xce   : > { %vm282_vm4 = vmor %vm280_vm3, %vm281_vm2 }
  0xcf   : > { %v277_v26 = vsub.f32 1.0, %v276_v25 }
  0xd1   : > { %v278_v28 = vmul.f32 %v499_v24, %v277_v26 }
  0xd3   : > { %v279_v30 = vadd.f32 %v499_v24, %v278_v28 }
  0xd5   : > { %v283_v32 = vsel %vm282_vm4, %v499_v24, %v279_v30 }
  0xd6   : > { %v288_v33 = vsel %vm285_vm5, %v287_v31, %v283_v32 }
  0xd7   : > { %v290_v34 = vmul.f32 %v288_v33, %v270_v20 }
  0xd9   : > { %v291_v35 = vperm.slane %v290_v34, 0 }
  0xdb   : > { %296 = vperm.xlu0 %494, %v291_v35  }
 0x14d   : > { %v297_v37 = vpop.permute.xlu0 %296 }
 0x14e   : > { %v298_v38 = vmul.f32 %v297_v37, %v259_v36 }
 0x150   : > { %v300_v39 = vsel %vm299_vm6, %v298_v38, 0.0 }
 0x151   : > { %v301_v40 = vrot.slane %v300_v39, 4 }
 0x153   : > { %v302_v41 = vadd.f32 %v301_v40, %v300_v39 }
 0x155   : > { %v303_v42 = vrot.slane %v302_v41, 2 }
 0x157   : > { %v304_v43 = vadd.f32 %v303_v42, %v302_v41 }
 0x159   : > { %v305_v44 = vrot.slane %v304_v43, 1 }
 0x15b   : > { %v306_v46 = vadd.f32 %v305_v44, %v304_v43 }
 0x15d   : > { %v307_v47 = vadd.f32 %v306_v46, %v260_v45 }
 0x15f   : > { %v439_v48 = vmul.f32 -1.442695, %v307_v47 }
 0x161   : > { %500 = vpow2.f32 %v439_v48 }
 0x167   : > { %v501_v49 = vpop.eup %500 }
 0x168   : > { %v311_v50 = vadd.f32 1.0, %v501_v49 }
 0x16a   : > { %502 = vrcp.f32 %v311_v50  ;;  %v323_v54 = vand.u32 2147483648, %v311_v50  ;;  %v321_v56 = vand.u32 2147483647, %v311_v50  ;;  %vm317_vm8 = vweird.f32 %v311_v50 }
 0x16c   : > { %v324_v58 = vor.u32 1.1754944e-38, %v323_v54  ;;  %vm322_vm10 = vcmp.eq.f32.partialorder %v321_v56, 8.507059e+37 }
 0x170   : > { %v503_v51 = vpop.eup %502 }
 0x171   : > { %v313_v52 = vmul.f32 %v503_v51, %v311_v50  ;;  %vm318_vm7 = vweird.f32 %v503_v51 }
 0x172   : > { %vm319_vm9 = vmor %vm317_vm8, %vm318_vm7 }
 0x173   : > { %v314_v53 = vsub.f32 1.0, %v313_v52 }
 0x175   : > { %v315_v55 = vmul.f32 %v503_v51, %v314_v53 }
 0x177   : > { %v316_v57 = vadd.f32 %v503_v51, %v315_v55 }
 0x179   : > { %v320_v59 = vsel %vm319_vm9, %v503_v51, %v316_v57 }
 0x17a   : > { %v325_v60 = vsel %vm322_vm10, %v324_v58, %v320_v59 }
 0x17b   : > { %v327_v61 = vperm.slane %v325_v60, 0 }
 0x17d   : > { %332 = vperm.xlu1 %495, %v327_v61  }
 0x1ef   : > { %v333_v2 = vpop.permute.xlu1 %332 }
 0x1f0   : > { %v338_v3 = vperm.slane %v333_v2, %v337_v1 }
 0x1f2   : > { %v340_v4 = vmul.f32 %v338_v3, %v729_v0 }
 0x1f4   : > { %341 = vst [vmem:[%s242_s12] sm:$0xff] %v340_v4 }
 0x1f5   : > { %561 = shalt.err (!%p558_p4)
}
 0x1f6   : > { %449 = dma.vmem_to_hbm [thread:$0]  (%p683_p11), %s357_s14, 128, %s359_s13, %s343_s15  }
 0x1f7 PF: > { %s370_s7 = sand.u32 1, %s588_s18   ;;  %p791_p7 = scmp.ge.s32.totalorder %s600_s21, 2 }
 0x1f8   : > { %s371_s26 = scalar_lea.sflag [#allocation4], %s370_s7 }
 0x1f9   : > { %p456_p5 = pnand %p791_p7, %p687_p12 }
 0x1fb   : > { %p457_p8 = pneg %p456_p5 }
 0x1fd   : > { %583 = dma.done.wait (%p457_p8), %s371_s26, 128  }
 0x1fe   : > { %585 = vsyncadd (%p457_p8), %s371_s26, 4294967168  ;;  %p18_p10 = scmp.ge.s32.totalorder %s658_s24, 4   ;;  %s792_s18 = smov %s592_s19 }
 0x1ff   : > { %s793_s19 = smov %s596_s20  ;;  %s794_s20 = smov %s670_s27 }
 0x200   : > { %s795_s21 = smov %s658_s24  ;;  %20 = sbr.rel (!%p18_p10) target bundleno = 5 (0x5), region = 85 }
 0x205   :  { %377 = vsyncpa [#allocation3], 1 }
 0x206   :  { %379 = vsyncpa [#allocation3 + $0x1], 1 }
 0x207   :  { %380 = vsyncpa [#allocation4], 1 }
 0x208   :  { %382 = vsyncpa [#allocation4 + $0x1], 1 }

</bundles_post_ra>
